<compile_context>
chip_gen: v5e
topology: v5e:2x2
jax: 0.10.0
libtpu: 0.0.40
codegen_flags: <defaults>
</compile_context>

<pallas_src>
import functools
from typing import NamedTuple

import jax
import jax.numpy as jnp
from jax.experimental import pallas as pl
from jax.experimental.pallas import tpu as pltpu


def _round_up(n, m):
    return (n + m - 1) // m * m


def _sigmoid(x):
    # One EUP (tanh) push instead of exp + reciprocal.
    return 0.5 * (1.0 + jnp.tanh(0.5 * x))


class LSTMParams(NamedTuple):
    wx: jnp.ndarray          # (input_size, n_tiles*4*bh) gate-contiguous per tile
    wh: jnp.ndarray          # (hidden_size, n_tiles*4*bh)
    b: jnp.ndarray           # (1, n_tiles*4*bh) float32, bias_ih + bias_hh folded
    input_size: int
    hidden_size: int
    padded_hidden: int       # Hp, multiple of 128
    block_h: int             # bh, multiple of 128, divides Hp


def _choose_block_h(Hp, K, itemsize, block_h=None):
    if block_h is None:
        bh = min(Hp, 512)
        # >= 2 hidden tiles when possible so the "parallel" axis can shard
        # across v7x's two TensorCores.
        if Hp >= 256:
            bh = min(bh, Hp // 2)
        # Cap the double-buffered weight stream at ~24 MiB (v7x scoped VMEM).
        budget = 24 * 1024 * 1024
        cap = budget // max(1, 2 * K * 4 * itemsize)
        bh = min(bh, max(128, cap))
    else:
        bh = block_h
    bh = max(128, (bh // 128) * 128)
    while Hp % bh:
        bh -= 128
    return bh


def prepare_lstm_weights(weight_ih, weight_hh, bias_ih, bias_hh,
                         dtype=jnp.float32, block_h=None):
    """Hoisted (call ONCE): transpose, fold biases, pad H, gate-contiguous tiles.

    Args (PyTorch layout, gate order [i, f, g, o]):
      weight_ih: (4H, input_size), weight_hh: (4H, hidden_size),
      bias_ih / bias_hh: (4H,).
      dtype: storage/matmul dtype of the weights (jnp.bfloat16 halves the
             dominant weight HBM stream and is MXU-native on v5e/v6e/v7x;
             gate math stays f32 in-kernel). Default f32 matches PyTorch
             numerics exactly.
    """
    four_h, input_size = weight_ih.shape
    H = four_h // 4
    Hp = _round_up(H, 128)
    K = input_size + H
    itemsize = jnp.dtype(dtype).itemsize
    bh = _choose_block_h(Hp, K, itemsize, block_h)
    n_tiles = Hp // bh

    def _tile_cols(w_t, rows):
        # w_t: (rows, 4H) with columns ordered gate-major then hidden.
        w = w_t.reshape(rows, 4, H)
        w = jnp.pad(w, ((0, 0), (0, 0), (0, Hp - H)))
        # Per hidden tile, gate-contiguous columns: col = t*4*bh + gate*bh + j.
        w = w.reshape(rows, 4, n_tiles, bh).transpose(0, 2, 1, 3)
        return w.reshape(rows, n_tiles * 4 * bh)

    wx = _tile_cols(weight_ih.T, input_size).astype(dtype)
    wh = _tile_cols(weight_hh.T, H).astype(dtype)
    b = (bias_ih + bias_hh).reshape(1, 4 * H)
    b = _tile_cols(b, 1).astype(jnp.float32)      # bias stays f32 (tiny)
    return LSTMParams(wx, wh, b, input_size, H, Hp, bh)


def lstm_cell_kernel(x_ref, h_ref, wx_ref, wh_ref, b_ref, c_ref,
                     h_out_ref, c_out_ref, *, block_h):
    """One hidden-dim tile of the LSTM cell.

    x_ref:  (B, input_size)     VMEM-resident (constant index map)
    h_ref:  (B, hidden_size)    VMEM-resident
    wx_ref: (input_size, 4*bh)  streamed; columns [i | f | g | o] for this tile
    wh_ref: (hidden_size, 4*bh) streamed
    b_ref:  (1, 4*bh)           streamed; folded bias (f32)
    c_ref:  (B, bh)             previous cell state tile
    """
    wdt = wx_ref.dtype
    x = x_ref[...].astype(wdt)
    h = h_ref[...].astype(wdt)

    # One N-fused dot per operand (N = 4*bh fills the MXU), f32 accumulation.
    g = jnp.dot(x, wx_ref[...], preferred_element_type=jnp.float32)
    g = g + jnp.dot(h, wh_ref[...], preferred_element_type=jnp.float32)
    g = g + b_ref[...]

    bh = block_h
    i = _sigmoid(g[:, 0 * bh:1 * bh])
    f = _sigmoid(g[:, 1 * bh:2 * bh])
    gg = jnp.tanh(g[:, 2 * bh:3 * bh])
    o = _sigmoid(g[:, 3 * bh:4 * bh])

    c_prev = c_ref[...].astype(jnp.float32)
    c_t = f * c_prev + i * gg
    h_t = o * jnp.tanh(c_t)

    h_out_ref[...] = h_t.astype(h_out_ref.dtype)
    c_out_ref[...] = c_t.astype(c_out_ref.dtype)


def lstm_cell(x, params, hidden=None):
    """Pallas LSTM cell step.

    Args:
      x:      (B, input_size)
      params: output of prepare_lstm_weights()
      hidden: optional (h_prev, c_prev), each (B, hidden_size); zeros if None
    Returns:
      (h_t, c_t), each (B, hidden_size), dtype of x.
    """
    B, input_size = x.shape
    assert input_size == params.input_size
    H = params.hidden_size
    Hp = params.padded_hidden
    bh = params.block_h
    n_tiles = Hp // bh

    if hidden is None:
        h_prev = jnp.zeros((B, H), x.dtype)
        c_prev = jnp.zeros((B, H), x.dtype)
    else:
        h_prev, c_prev = hidden

    # Lane-pad the cell state only when H isn't already a multiple of 128;
    # keep its dtype (kernel upcasts to f32 in the VPU for free).
    c_in = c_prev if Hp == H else jnp.pad(c_prev, ((0, 0), (0, Hp - H)))

    # Explicit scoped-VMEM limit sized from the actual blocks (v7x default 32 MiB).
    w_isz = jnp.dtype(params.wx.dtype).itemsize
    x_isz = jnp.dtype(x.dtype).itemsize
    c_isz = jnp.dtype(c_in.dtype).itemsize
    block_bytes = ((input_size + H) * 4 * bh * w_isz   # weight tiles
                   + 4 * bh * 4                        # bias tile (f32)
                   + B * bh * c_isz                    # c tile
                   + 2 * B * bh * x_isz)               # h_out + c_out tiles
    resident_bytes = B * (input_size + H) * x_isz
    est = 2 * block_bytes + resident_bytes             # double buffering
    vmem_limit = int(min(64 * 2 ** 20, max(32 * 2 ** 20, 2 * est)))

    kernel = functools.partial(lstm_cell_kernel, block_h=bh)

    h_p, c_p = pl.pallas_call(
        kernel,
        out_shape=(jax.ShapeDtypeStruct((B, Hp), x.dtype),
                   jax.ShapeDtypeStruct((B, Hp), x.dtype)),
        grid_spec=pltpu.PrefetchScalarGridSpec(
            num_scalar_prefetch=0,
            grid=(n_tiles,),
            in_specs=[
                pl.BlockSpec((B, input_size), lambda j: (0, 0)),       # x (resident)
                pl.BlockSpec((B, H), lambda j: (0, 0)),                # h_prev (resident)
                pl.BlockSpec((input_size, 4 * bh), lambda j: (0, j)),  # Wx tile
                pl.BlockSpec((H, 4 * bh), lambda j: (0, j)),           # Wh tile
                pl.BlockSpec((1, 4 * bh), lambda j: (0, j)),           # bias tile
                pl.BlockSpec((B, bh), lambda j: (0, j)),               # c_prev tile
            ],
            out_specs=(
                pl.BlockSpec((B, bh), lambda j: (0, j)),
                pl.BlockSpec((B, bh), lambda j: (0, j)),
            ),
        ),
        compiler_params=pltpu.CompilerParams(
            dimension_semantics=("parallel",),   # hidden tiles shard across TCs
            vmem_limit_bytes=vmem_limit,
        ),
    )(x, h_prev, params.wx, params.wh, params.b, c_in)

    if Hp == H:
        return h_p, c_p
    return h_p[:, :H], c_p[:, :H]


def xavier_uniform(key, shape, dtype=jnp.float32):
    # Matches torch.nn.init.xavier_uniform_ for a 2-D weight (fan_out, fan_in).
    fan_out, fan_in = shape
    bound = jnp.sqrt(6.0 / (fan_in + fan_out))
    return jax.random.uniform(key, shape, dtype, minval=-bound, maxval=bound)


def _lstm_ref(x, h_prev, c_prev, weight_ih, weight_hh, bias_ih, bias_hh):
    # Pure-JAX reference, same math as the PyTorch forward.
    gates = x @ weight_ih.T + bias_ih + h_prev @ weight_hh.T + bias_hh
    i, f, g, o = jnp.split(gates, 4, axis=1)
    i, f, g, o = jax.nn.sigmoid(i), jax.nn.sigmoid(f), jnp.tanh(g), jax.nn.sigmoid(o)
    c_t = f * c_prev + i * g
    h_t = o * jnp.tanh(c_t)
    return h_t, c_t


if __name__ == "__main__":
    batch = 2
    input_size = 16
    hidden_size = 32

    key = jax.random.PRNGKey(0)
    k_x, k_h, k_c, k_wih, k_whh, k_b = jax.random.split(key, 6)

    x = jax.random.normal(k_x, (batch, input_size), jnp.float32)
    h_prev = jax.random.normal(k_h, (batch, hidden_size), jnp.float32)
    c_prev = jax.random.normal(k_c, (batch, hidden_size), jnp.float32)

    weight_ih = xavier_uniform(k_wih, (4 * hidden_size, input_size))
    weight_hh = xavier_uniform(k_whh, (4 * hidden_size, hidden_size))
    bias_ih = jnp.zeros((4 * hidden_size,), jnp.float32)   # module init: zeros
    bias_hh = jnp.zeros((4 * hidden_size,), jnp.float32)

    # Hoisted once (NOT per step): transpose, bias fold, pad, per-tile layout.
    params = prepare_lstm_weights(weight_ih, weight_hh, bias_ih, bias_hh)

    h_t, c_t = lstm_cell(x, params, hidden=(h_prev, c_prev))
    jax.block_until_ready((h_t, c_t))

    h_ref, c_ref = _lstm_ref(x, h_prev, c_prev, weight_ih, weight_hh,
                             bias_ih, bias_hh)
    assert jnp.allclose(h_t, h_ref, atol=1e-5), "h_t mismatch (f32)"
    assert jnp.allclose(c_t, c_ref, atol=1e-5), "c_t mismatch (f32)"

    # hidden=None path.
    h0, c0 = lstm_cell(x, params, hidden=None)
    jax.block_until_ready((h0, c0))
    z = jnp.zeros((batch, hidden_size), jnp.float32)
    h0_ref, c0_ref = _lstm_ref(x, z, z, weight_ih, weight_hh, bias_ih, bias_hh)
    assert jnp.allclose(h0, h0_ref, atol=1e-5), "h_t mismatch (hidden=None)"
    assert jnp.allclose(c0, c0_ref, atol=1e-5), "c_t mismatch (hidden=None)"

    # Non-zero biases to exercise the folded-bias path.
    bias_ih2 = 0.1 * jax.random.normal(k_b, (4 * hidden_size,), jnp.float32)
    bias_hh2 = -0.05 * bias_ih2 + 0.02
    params_b = prepare_lstm_weights(weight_ih, weight_hh, bias_ih2, bias_hh2)
    hb, cb = lstm_cell(x, params_b, hidden=(h_prev, c_prev))
    jax.block_until_ready((hb, cb))
    hb_ref, cb_ref = _lstm_ref(x, h_prev, c_prev, weight_ih, weight_hh,
                               bias_ih2, bias_hh2)
    assert jnp.allclose(hb, hb_ref, atol=1e-5), "h_t mismatch (bias)"
    assert jnp.allclose(cb, cb_ref, atol=1e-5), "c_t mismatch (bias)"

    # Optional bf16 weight path (v5e/v6e/v7x MXU-native, halves weight DMA);
    # gate math stays f32 in-kernel, so only a small numeric delta vs f32.
    params_bf16 = prepare_lstm_weights(weight_ih, weight_hh, bias_ih, bias_hh,
                                       dtype=jnp.bfloat16)
    h16, c16 = lstm_cell(x, params_bf16, hidden=(h_prev, c_prev))
    jax.block_until_ready((h16, c16))
    assert jnp.allclose(h16, h_ref, atol=5e-2), "h_t mismatch (bf16 weights)"
    assert jnp.allclose(c16, c_ref, atol=5e-2), "c_t mismatch (bf16 weights)"

    print("KERNEL_OK")
</pallas_src>

<mosaic_0001>
module attributes {stable_mosaic.version = 11 : i64} {
  func.func @lstm_cell_kernel(%arg0: i32, %arg1: memref<2x16xf32, #tpu.memory_space<vmem>>, %arg2: memref<2x32xf32, #tpu.memory_space<vmem>>, %arg3: memref<16x512xf32, #tpu.memory_space<vmem>>, %arg4: memref<32x512xf32, #tpu.memory_space<vmem>>, %arg5: memref<1x512xf32, #tpu.memory_space<vmem>>, %arg6: memref<2x128xf32, #tpu.memory_space<vmem>>, %arg7: memref<2x128xf32, #tpu.memory_space<vmem>>, %arg8: memref<2x128xf32, #tpu.memory_space<vmem>>) attributes {dimension_semantics = [#tpu.dimension_semantics<parallel>], iteration_bounds = array<i64: 1>, scalar_prefetch = 0 : i64, scratch_operands = 0 : i64, tpu.core_type = #tpu.core_type<tc>, window_params = [{pipeline_mode = #tpu.pipeline_mode<synchronous>, transform_indices = @transform_0, window_bounds = array<i64: 2, 16>}, {pipeline_mode = #tpu.pipeline_mode<synchronous>, transform_indices = @transform_1, window_bounds = array<i64: 2, 32>}, {transform_indices = @transform_2, window_bounds = array<i64: 16, 512>}, {transform_indices = @transform_3, window_bounds = array<i64: 32, 512>}, {transform_indices = @transform_4, window_bounds = array<i64: 1, 512>}, {transform_indices = @transform_5, window_bounds = array<i64: 2, 128>}, {transform_indices = @transform_6, window_bounds = array<i64: 2, 128>}, {transform_indices = @transform_7, window_bounds = array<i64: 2, 128>}]} {
    %c0 = arith.constant 0 : index
    %c0_0 = arith.constant 0 : index
    %0 = vector.load %arg1[%c0, %c0_0] : memref<2x16xf32, #tpu.memory_space<vmem>>, vector<2x16xf32>
    %c0_1 = arith.constant 0 : index
    %c0_2 = arith.constant 0 : index
    %1 = vector.load %arg2[%c0_1, %c0_2] : memref<2x32xf32, #tpu.memory_space<vmem>>, vector<2x32xf32>
    %c0_3 = arith.constant 0 : index
    %c0_4 = arith.constant 0 : index
    %2 = vector.load %arg3[%c0_3, %c0_4] : memref<16x512xf32, #tpu.memory_space<vmem>>, vector<16x512xf32>
    %cst = arith.constant dense<0.000000e+00> : vector<2x512xf32>
    %3 = tpu.matmul %0, %2, %cst {dimension_numbers = #tpu.dot_dimension_numbers<[1], [0], [0], [1], [0, 0, 1, 1], [], []>} : vector<2x16xf32>, vector<16x512xf32>, vector<2x512xf32> -> vector<2x512xf32>
    %c0_5 = arith.constant 0 : index
    %c0_6 = arith.constant 0 : index
    %4 = vector.load %arg4[%c0_5, %c0_6] : memref<32x512xf32, #tpu.memory_space<vmem>>, vector<32x512xf32>
    %cst_7 = arith.constant dense<0.000000e+00> : vector<2x512xf32>
    %5 = tpu.matmul %1, %4, %cst_7 {dimension_numbers = #tpu.dot_dimension_numbers<[1], [0], [0], [1], [0, 0, 1, 1], [], []>} : vector<2x32xf32>, vector<32x512xf32>, vector<2x512xf32> -> vector<2x512xf32>
    %6 = arith.addf %3, %5 : vector<2x512xf32>
    %c0_8 = arith.constant 0 : index
    %c0_9 = arith.constant 0 : index
    %7 = vector.load %arg5[%c0_8, %c0_9] : memref<1x512xf32, #tpu.memory_space<vmem>>, vector<1x512xf32>
    %8 = vector.broadcast %7 : vector<1x512xf32> to vector<2x512xf32>
    %9 = arith.addf %6, %8 : vector<2x512xf32>
    %10 = vector.extract_strided_slice %9 {offsets = [0, 0], sizes = [2, 128], strides = [1, 1]} : vector<2x512xf32> to vector<2x128xf32>
    %cst_10 = arith.constant 5.000000e-01 : f32
    %11 = vector.broadcast %cst_10 : f32 to vector<2x128xf32>
    %12 = arith.mulf %11, %10 : vector<2x128xf32>
    %13 = math.tanh %12 : vector<2x128xf32>
    %cst_11 = arith.constant 1.000000e+00 : f32
    %14 = vector.broadcast %cst_11 : f32 to vector<2x128xf32>
    %15 = arith.addf %14, %13 : vector<2x128xf32>
    %cst_12 = arith.constant 5.000000e-01 : f32
    %16 = vector.broadcast %cst_12 : f32 to vector<2x128xf32>
    %17 = arith.mulf %16, %15 : vector<2x128xf32>
    %18 = vector.extract_strided_slice %9 {offsets = [0, 128], sizes = [2, 128], strides = [1, 1]} : vector<2x512xf32> to vector<2x128xf32>
    %cst_13 = arith.constant 5.000000e-01 : f32
    %19 = vector.broadcast %cst_13 : f32 to vector<2x128xf32>
    %20 = arith.mulf %19, %18 : vector<2x128xf32>
    %21 = math.tanh %20 : vector<2x128xf32>
    %cst_14 = arith.constant 1.000000e+00 : f32
    %22 = vector.broadcast %cst_14 : f32 to vector<2x128xf32>
    %23 = arith.addf %22, %21 : vector<2x128xf32>
    %cst_15 = arith.constant 5.000000e-01 : f32
    %24 = vector.broadcast %cst_15 : f32 to vector<2x128xf32>
    %25 = arith.mulf %24, %23 : vector<2x128xf32>
    %26 = vector.extract_strided_slice %9 {offsets = [0, 256], sizes = [2, 128], strides = [1, 1]} : vector<2x512xf32> to vector<2x128xf32>
    %27 = math.tanh %26 : vector<2x128xf32>
    %28 = vector.extract_strided_slice %9 {offsets = [0, 384], sizes = [2, 128], strides = [1, 1]} : vector<2x512xf32> to vector<2x128xf32>
    %cst_16 = arith.constant 5.000000e-01 : f32
    %29 = vector.broadcast %cst_16 : f32 to vector<2x128xf32>
    %30 = arith.mulf %29, %28 : vector<2x128xf32>
    %31 = math.tanh %30 : vector<2x128xf32>
    %cst_17 = arith.constant 1.000000e+00 : f32
    %32 = vector.broadcast %cst_17 : f32 to vector<2x128xf32>
    %33 = arith.addf %32, %31 : vector<2x128xf32>
    %cst_18 = arith.constant 5.000000e-01 : f32
    %34 = vector.broadcast %cst_18 : f32 to vector<2x128xf32>
    %35 = arith.mulf %34, %33 : vector<2x128xf32>
    %c0_19 = arith.constant 0 : index
    %c0_20 = arith.constant 0 : index
    %36 = vector.load %arg6[%c0_19, %c0_20] : memref<2x128xf32, #tpu.memory_space<vmem>>, vector<2x128xf32>
    %37 = arith.mulf %25, %36 : vector<2x128xf32>
    %38 = arith.mulf %17, %27 : vector<2x128xf32>
    %39 = arith.addf %37, %38 : vector<2x128xf32>
    %40 = math.tanh %39 : vector<2x128xf32>
    %41 = arith.mulf %35, %40 : vector<2x128xf32>
    %c0_21 = arith.constant 0 : index
    %c0_22 = arith.constant 0 : index
    %42 = vector.load %arg7[%c0_21, %c0_22] : memref<2x128xf32, #tpu.memory_space<vmem>>, vector<2x128xf32>
    tpu.vector_store %arg7[%c0_21, %c0_22], %41 {strides = array<i32>} : memref<2x128xf32, #tpu.memory_space<vmem>>, vector<2x128xf32>,
    %c0_23 = arith.constant 0 : index
    %c0_24 = arith.constant 0 : index
    %43 = vector.load %arg8[%c0_23, %c0_24] : memref<2x128xf32, #tpu.memory_space<vmem>>, vector<2x128xf32>
    tpu.vector_store %arg8[%c0_23, %c0_24], %39 {strides = array<i32>} : memref<2x128xf32, #tpu.memory_space<vmem>>, vector<2x128xf32>,
    return
  }
  func.func @transform_0(%arg0: i32) -> (i32, i32) {
    %c0_i32 = arith.constant 0 : i32
    %c0_i32_0 = arith.constant 0 : i32
    %c0_i32_1 = arith.constant 0 : i32
    return %c0_i32, %c0_i32_0 : i32, i32
  }
  func.func @transform_1(%arg0: i32) -> (i32, i32) {
    %c0_i32 = arith.constant 0 : i32
    %c0_i32_0 = arith.constant 0 : i32
    %c0_i32_1 = arith.constant 0 : i32
    return %c0_i32, %c0_i32_0 : i32, i32
  }
  func.func @transform_2(%arg0: i32) -> (i32, i32) {
    %c0_i32 = arith.constant 0 : i32
    %c0_i32_0 = arith.constant 0 : i32
    return %c0_i32, %arg0 : i32, i32
  }
  func.func @transform_3(%arg0: i32) -> (i32, i32) {
    %c0_i32 = arith.constant 0 : i32
    %c0_i32_0 = arith.constant 0 : i32
    return %c0_i32, %arg0 : i32, i32
  }
  func.func @transform_4(%arg0: i32) -> (i32, i32) {
    %c0_i32 = arith.constant 0 : i32
    %c0_i32_0 = arith.constant 0 : i32
    return %c0_i32, %arg0 : i32, i32
  }
  func.func @transform_5(%arg0: i32) -> (i32, i32) {
    %c0_i32 = arith.constant 0 : i32
    %c0_i32_0 = arith.constant 0 : i32
    return %c0_i32, %arg0 : i32, i32
  }
  func.func @transform_6(%arg0: i32) -> (i32, i32) {
    %c0_i32 = arith.constant 0 : i32
    %c0_i32_0 = arith.constant 0 : i32
    return %c0_i32, %arg0 : i32, i32
  }
  func.func @transform_7(%arg0: i32) -> (i32, i32) {
    %c0_i32 = arith.constant 0 : i32
    %c0_i32_0 = arith.constant 0 : i32
    return %c0_i32, %arg0 : i32, i32
  }
}

</mosaic_0001>

<bundles_post_ra>
// kernel: tpu_custom_call.1
= control target key start
LH: loop header
LB: loop body
LE: loop exit
PB: predicated region body
PF: predicated region fallthrough
CT: control target
= control target key end

     0   :  { %13 = vsyncpa [#allocation3], 0  ;;  %s641_s0 = inlined_call_operand.hbm [shape: f32[2,16], index: 0, kind: input, shape index: {}]   ;;  %s642_s1 = inlined_call_operand.hbm [shape: f32[2,32], index: 1, kind: input, shape index: {}]   ;;  %s643_s2 = inlined_call_operand.hbm [shape: f32[16,512], index: 2, kind: input, shape index: {}]   ;;  %s644_s3 = inlined_call_operand.hbm [shape: f32[32,512], index: 3, kind: input, shape index: {}]   ;;  %s645_s4 = inlined_call_operand.hbm [shape: f32[1,512], index: 4, kind: input, shape index: {}]   ;;  %s646_s5 = inlined_call_operand.vmem [shape: f32[2,128], index: 5, kind: input, shape index: {}]   ;;  %s647_s6 = inlined_call_operand.hbm [shape: f32[2,128], index: 6, kind: output, shape index: {0}]   ;;  %s648_s7 = inlined_call_operand.hbm [shape: f32[2,128], index: 7, kind: output, shape index: {1}]  }
   0x1   :  { %14 = vsyncpa [#allocation6], 0 }
   0x2   :  { %15 = vsyncpa [#allocation9], 0 }
   0x3   :  { %16 = vsyncpa [#allocation4], 0  ;;  %s34_s26 = sshll.u32 %s642_s1, 4  ;;  %s35_s26 = int_to_ptr.hbm [resolvable:$true] %s34_s26 }
   0x4   :  { %17 = vsyncpa [#allocation13], 0  ;;  %s568_s27 = smov [#allocation5]   ;;  %s57_s8 = sshll.u32 %s644_s3, 4  ;;  %s58_s8 = int_to_ptr.hbm [resolvable:$true] %s57_s8 }
   0x5   :  { %s36_s28 = sshll.u32 %s568_s27, 4  ;;  %s569_s9 = smov [#allocation8]   ;;  %s37_s28 = int_to_ptr.vmem [resolvable:$true] %s36_s28 }
   0x6   :  { %39 = dma.hbm_to_vmem [thread:$0]  %s35_s26, 32, %s37_s28, [#allocation6]  }
   0x7   :  { %s59_s10 = sshll.u32 %s569_s9, 4  ;;  %s23_s13 = sshll.u32 %s641_s0, 4  ;;  %s60_s10 = int_to_ptr.vmem [resolvable:$true] %s59_s10  ;;  %s24_s13 = int_to_ptr.hbm [resolvable:$true] %s23_s13 }
   0x8   :  { %s570_s1 = smov 512   ;;  %s571_s14 = smov 32  }
   0x9   :  { %65 = dma.hbm_to_vmem [thread:$0]  %s58_s8, 2048, %s60_s10, [#allocation9], %s570_s1, %s570_s1, %s571_s14  }
   0xa   :  { %s44_s17 = sshll.u32 %s643_s2, 4  ;;  %s572_s18 = smov [#allocation2]   ;;  %s45_s17 = int_to_ptr.hbm [resolvable:$true] %s44_s17 }
   0xb   :  { %s25_s19 = sshll.u32 %s572_s18, 4  ;;  %s573_s3 = smov [#allocation7]   ;;  %s26_s19 = int_to_ptr.vmem [resolvable:$true] %s25_s19 }
   0xc   :  { %28 = dma.hbm_to_vmem [thread:$0]  %s24_s13, 32, %s26_s19, [#allocation3]  }
   0xd   :  { %s46_s20 = sshll.u32 %s573_s3, 4  ;;  %s71_s0 = sshll.u32 %s645_s4, 4  ;;  %s47_s20 = int_to_ptr.vmem [resolvable:$true] %s46_s20  ;;  %s72_s0 = int_to_ptr.hbm [resolvable:$true] %s71_s0 }
   0xe   :  { %52 = dma.hbm_to_vmem [thread:$0]  %s45_s17, 1024, %s47_s20, [#allocation6], %s570_s1, %s570_s1, %s571_s14  }
   0xf   :  { %s574_s23 = smov [#allocation10]  }
  0x10   :  { %s73_s24 = sshll.u32 %s574_s23, 4  ;;  %s74_s24 = int_to_ptr.vmem [resolvable:$true] %s73_s24 }
  0x11   :  { %76 = dma.hbm_to_vmem [thread:$0]  %s72_s0, 64, %s74_s24, [#allocation9]  }
  0x12   :  { %558 = dma.done.wait [#allocation3], 32  }
  0x13   :  { %559 = vsyncadd [#allocation3], 4294967264 }
  0x14   :  { %560 = dma.done.wait [#allocation6], 1056  }
  0x15   :  { %561 = vsyncadd [#allocation6], 4294966240 }
  0x16   :  { %562 = dma.done.wait [#allocation9], 2112  }
  0x17   :  { %563 = vsyncadd [#allocation9], 4294965184  ;;  %v121_v0 = vld [vmem:[#allocation8 + $0x60] sm:$0xff]  ;;  %v122_v1 = vld [vmem:[#allocation8 + $0x68] sm:$0xff]  ;;  %vm125_vm0 = vcmask 261120   ;;  %vm209_vm1 = vcmask 130048  }
  0x18   :  { %v123_v2 = vld [vmem:[#allocation8 + $0x70] sm:$0xff]  ;;  %141 = vmatpush.msra.mxu0 %v121_v0  ;;  %161 = vmatpush.msra.mxu1 %v122_v1  ;;  %v124_v3 = vld [vmem:[#allocation8 + $0x78] sm:$0xff]  ;;  %v117_v4 = vld [vmem:[#allocation8 + $0x40] sm:$0xff]  ;;  %s575_s25 = smov [#allocation12]   ;;  %s346_s29 = sshll.u32 %s648_s7, 4  ;;  %s347_s29 = int_to_ptr.hbm [resolvable:$true] %s346_s29 }
  0x19   :  { %v118_v5 = vld [vmem:[#allocation8 + $0x48] sm:$0xff]  ;;  %181 = vmatpush.msra.mxu2 %v123_v2  ;;  %201 = vmatpush.msra.mxu3 %v124_v3  ;;  %v119_v6 = vld [vmem:[#allocation8 + $0x50] sm:$0xff]  ;;  %v120_v7 = vld [vmem:[#allocation8 + $0x58] sm:$0xff]  ;;  %s344_s26 = sshll.u32 %s575_s25, 4  ;;  %s576_s30 = smov [#allocation11]   ;;  %s345_s26 = int_to_ptr.vmem [resolvable:$true] %s344_s26 }
  0x1a   :  { %v113_v8 = vld [vmem:[#allocation8 + $0x20] sm:$0xff]  ;;  %142 = vmatpush.msra.mxu0 %v117_v4  ;;  %162 = vmatpush.msra.mxu1 %v118_v5  ;;  %v114_v9 = vld [vmem:[#allocation8 + $0x28] sm:$0xff]  ;;  %v115_v10 = vld [vmem:[#allocation8 + $0x30] sm:$0xff]  ;;  %s335_s10 = sshll.u32 %s647_s6, 4  ;;  %s336_s10 = int_to_ptr.hbm [resolvable:$true] %s335_s10 }
  0x1b   :  { %v116_v11 = vld [vmem:[#allocation8 + $0x38] sm:$0xff]  ;;  %182 = vmatpush.msra.mxu2 %v119_v6  ;;  %202 = vmatpush.msra.mxu3 %v120_v7  ;;  %v109_v12 = vld [vmem:[#allocation8] sm:$0xff]  ;;  %v110_v13 = vld [vmem:[#allocation8 + $0x8] sm:$0xff] }
  0x1c   :  { %143 = vmatpush.msra.mxu0 %v113_v8  ;;  %163 = vmatpush.msra.mxu1 %v114_v9  ;;  %v111_v14 = vld [vmem:[#allocation8 + $0x10] sm:$0xff]  ;;  %v112_v15 = vld [vmem:[#allocation8 + $0x18] sm:$0xff]  ;;  %v105_v17 = vld [vmem:[#allocation7 + $0x20] sm:$0xff] }
  0x1d   :  { %183 = vmatpush.msra.mxu2 %v115_v10  ;;  %203 = vmatpush.msra.mxu3 %v116_v11  ;;  %v100_v16 = vld [vmem:[#allocation5] sm:$0x3]  ;;  %v106_v18 = vld [vmem:[#allocation7 + $0x28] sm:$0xff]  ;;  %v107_v19 = vld [vmem:[#allocation7 + $0x30] sm:$0xff] }
  0x1e   :  { %144 = vmatpush.msra.mxu0 %v109_v12  ;;  %164 = vmatpush.msra.mxu1 %v110_v13  ;;  %v108_v20 = vld [vmem:[#allocation7 + $0x38] sm:$0xff]  ;;  %v101_v21 = vld [vmem:[#allocation7] sm:$0xff]  ;;  %v102_v22 = vld [vmem:[#allocation7 + $0x8] sm:$0xff] }
  0x1f   :  { %184 = vmatpush.msra.mxu2 %v111_v14  ;;  %204 = vmatpush.msra.mxu3 %v112_v15  ;;  %v103_v23 = vld [vmem:[#allocation7 + $0x10] sm:$0xff]  ;;  %v104_v24 = vld [vmem:[#allocation7 + $0x18] sm:$0xff]  ;;  %v293_v28 = vld [vmem:[#allocation10] sm:$0xf] }
  0x20   :  { %363 = vmatmul.msk.f32.vlgmr.msra.gmra.mxu0 %vm125_vm0, %v100_v16  ;;  %364 = vmatmul.msk.f32.vlgmr.msra.gmra.mxu1 %vm125_vm0, %v100_v16  ;;  %v99_v25 = vld [vmem:[#allocation2] sm:$0x3]  ;;  %v295_v31 = vperm.slane %v293_v28, 0  ;;  %v296_v32 = vperm.slane %v293_v28, 1  ;;  %v297_v41 = vperm.slane %v293_v28, 2  ;;  %v298_v42 = vperm.slane %v293_v28, 3 }
  0x21   :  { %365 = vmatmul.msk.f32.vlgmr.msra.gmra.mxu2 %vm125_vm0, %v100_v16  ;;  %366 = vmatmul.msk.f32.vlgmr.msra.gmra.mxu3 %vm125_vm0, %v100_v16  ;;  %v320_v55 = vld [vmem:[%s646_s5] sm:$0x3]  ;;  %s333_s5 = sshll.u32 %s576_s30, 4  ;;  %s334_s5 = int_to_ptr.vmem [resolvable:$true] %s333_s5 }
  0x22   :  { %227 = vmatpush.msrb.mxu0 %v105_v17  ;;  %247 = vmatpush.msrb.mxu1 %v106_v18 }
  0x23   :  { %267 = vmatpush.msrb.mxu2 %v107_v19  ;;  %287 = vmatpush.msrb.mxu3 %v108_v20 }
  0x24   :  { %228 = vmatpush.msrb.mxu0 %v101_v21  ;;  %248 = vmatpush.msrb.mxu1 %v102_v22 }
  0x25   :  { %268 = vmatpush.msrb.mxu2 %v103_v23  ;;  %288 = vmatpush.msrb.mxu3 %v104_v24 }
  0x28   :  { %367 = vmatmul.msk.f32.vlgmr.msrb.gmra.mxu0 %vm209_vm1, %v99_v25  ;;  %368 = vmatmul.msk.f32.vlgmr.msrb.gmra.mxu1 %vm209_vm1, %v99_v25 }
  0x29   :  { %369 = vmatmul.msk.f32.vlgmr.msrb.gmra.mxu2 %vm209_vm1, %v99_v25  ;;  %370 = vmatmul.msk.f32.vlgmr.msrb.gmra.mxu3 %vm209_vm1, %v99_v25 }
  0x9d   :  { %v146_v26 = vpop.f32.mrf.mxu0  ;;  %v166_v27 = vpop.f32.mrf.mxu1 }
  0xa4   :  { %v186_v29 = vpop.f32.mrf.mxu2  ;;  %v206_v30 = vpop.f32.mrf.mxu3 }
  0xa5   :  { %v230_v33 = vpop.f32.mrf.mxu0  ;;  %v250_v34 = vpop.f32.mrf.mxu1 }
  0xa6   :  { %v231_v35 = vadd.f32 %v230_v33, %v146_v26  ;;  %v251_v36 = vadd.f32 %v250_v34, %v166_v27 }
  0xa8   :  { %v303_v37 = vadd.f32 %v295_v31, %v231_v35  ;;  %v304_v38 = vadd.f32 %v296_v32, %v251_v36 }
  0xaa   :  { %v307_v39 = vmul.f32 0.5, %v303_v37  ;;  %v311_v40 = vmul.f32 0.5, %v304_v38 }
  0xac   :  { %380 = vtanh.f32 %v307_v39  ;;  %v270_v43 = vpop.f32.mrf.mxu2  ;;  %v290_v44 = vpop.f32.mrf.mxu3 }
  0xad   :  { %382 = vtanh.f32 %v311_v40  ;;  %v271_v45 = vadd.f32 %v270_v43, %v186_v29  ;;  %v291_v46 = vadd.f32 %v290_v44, %v206_v30 }
  0xaf   :  { %v305_v47 = vadd.f32 %v297_v41, %v271_v45  ;;  %v306_v48 = vadd.f32 %v298_v42, %v291_v46 }
  0xb1   :  { %384 = vtanh.f32 %v305_v47  ;;  %v316_v49 = vmul.f32 0.5, %v306_v48 }
  0xb2   :  { %v381_v50 = vpop.eup %380 }
  0xb3   :  { %v383_v51 = vpop.eup %382  ;;  %v309_v52 = vadd.f32 1.0, %v381_v50  ;;  %386 = vtanh.f32 %v316_v49 }
  0xb4   :  { %v313_v53 = vadd.f32 1.0, %v383_v51 }
  0xb5   :  { %v310_v54 = vmul.f32 0.5, %v309_v52 }
  0xb6   :  { %v314_v56 = vmul.f32 0.5, %v313_v53 }
  0xb7   :  { %v385_v57 = vpop.eup %384 }
  0xb8   :  { %v321_v58 = vmul.f32 %v320_v55, %v314_v56  ;;  %v322_v59 = vmul.f32 %v385_v57, %v310_v54 }
  0xb9   :  { %v387_v60 = vpop.eup %386 }
  0xba   :  { %v323_v61 = vadd.f32 %v322_v59, %v321_v58  ;;  %v318_v62 = vadd.f32 1.0, %v387_v60 }
  0xbc   :  { %327 = vst [vmem:[#allocation12] sm:$0x3] %v323_v61  ;;  %388 = vtanh.f32 %v323_v61  ;;  %v319_v63 = vmul.f32 0.5, %v318_v62 }
  0xbd   :  { %349 = dma.vmem_to_hbm [thread:$0]  %s345_s26, 32, %s347_s29, [#allocation13]  }
  0xc2   :  { %v389_v0 = vpop.eup %388 }
  0xc3   :  { %v325_v1 = vmul.f32 %v389_v0, %v319_v63 }
  0xc5   :  { %326 = vst [vmem:[#allocation11] sm:$0x3] %v325_v1 }
  0xc6   :  { %338 = dma.vmem_to_hbm [thread:$0]  %s334_s5, 32, %s336_s10, [#allocation4]  }
  0xc7   :  { %564 = dma.done.wait [#allocation4], 32  }
  0xc8   :  { %565 = vsyncadd [#allocation4], 4294967264 }
  0xc9   :  { %566 = dma.done.wait [#allocation13], 32  }
  0xca   :  { %567 = vsyncadd [#allocation13], 4294967264 }
  0xcb   :  { %358 = vsyncpa [#allocation3], 1 }
  0xcc   :  { %359 = vsyncpa [#allocation6], 1 }
  0xcd   :  { %360 = vsyncpa [#allocation9], 1 }
  0xce   :  { %361 = vsyncpa [#allocation4], 1 }
  0xcf   :  { %362 = vsyncpa [#allocation13], 1 }

</bundles_post_ra>
